<compile_context>
chip_gen: v6e
topology: v6e:2x2x1
jax: 0.10.0
libtpu: 0.0.40
codegen_flags: <defaults>
</compile_context>

<pallas_src>
import functools

import jax
import jax.numpy as jnp
from jax.experimental import pallas as pl
from jax.experimental.pallas import tpu as pltpu


def _round_up(x, m):
    return (x + m - 1) // m * m


# --------------------------------------------------------------------------- #
# Kernel
# --------------------------------------------------------------------------- #
def _attention_layer_kernel(x_ref, wt_ref, b_ref, mask_ref, o_ref, *, mxu_dtype):
    # x_ref: (TB, Fp)   wt_ref: (Fp, Fp) == W^T (padded)
    # b_ref: (1, Fp) f32   mask_ref: (1, Fp) f32 additive lane mask   o_ref: (TB, Fp)
    x = x_ref[...]
    x_mxu = x if mxu_dtype is None else x.astype(mxu_dtype)

    # Linear: X @ W^T + b.  wt_ref already holds W^T, so this is the MXU-native
    # (1,0) contraction -- no in-kernel weight re-layout / transpose.
    lin = jnp.dot(x_mxu, wt_ref[...], preferred_element_type=jnp.float32)
    lin = lin + b_ref[...]

    # Elementwise gate (f32) + additive lane mask (0 valid, -1e30 padded lanes).
    logits = x.astype(jnp.float32) * lin + mask_ref[...]

    # Softmax along the feature (lane) axis == dim=1 of the original module.
    m = jnp.max(logits, axis=-1, keepdims=True)
    e = jnp.exp(logits - m)
    denom = jnp.sum(e, axis=-1, keepdims=True)
    # approx reciprocal runs on the otherwise-idle EUP slot (~1e-3 rel error).
    o_ref[...] = (e * pl.reciprocal(denom, approx=True)).astype(o_ref.dtype)


# --------------------------------------------------------------------------- #
# One-time (off hot path) parameter / input layout prep
# --------------------------------------------------------------------------- #
def prepare_attention_params(weight, bias, *, f_pad=None, mxu_dtype=None):
    """Pad + pre-transpose nn.Linear params to the kernel layout.  Run ONCE.

    weight: (F, F) in nn.Linear [out, in] layout.  bias: (F,).
    Returns (wT_pad (Fp,Fp), b_pad (1,Fp) f32, lane_mask (1,Fp) f32)."""
    f = weight.shape[0]
    if f_pad is None:
        f_pad = max(128, _round_up(f, 128))
    w_dtype = weight.dtype if mxu_dtype is None else mxu_dtype
    wt_pad = jnp.zeros((f_pad, f_pad), w_dtype).at[:f, :f].set(weight.T.astype(w_dtype))
    b_pad = jnp.zeros((1, f_pad), jnp.float32).at[0, :f].set(bias.astype(jnp.float32))
    lane_mask = jnp.full((1, f_pad), -1e30, jnp.float32).at[0, :f].set(0.0)
    return wt_pad, b_pad, lane_mask


def prepare_attention_input(x, f_pad):
    """Lane-pad X's feature axis (only needed when F % 128 != 0).  For static
    shapes do this once, outside the per-call hot path, like the params."""
    b, f = x.shape
    if f == f_pad:
        return x
    return jnp.zeros((b, f_pad), x.dtype).at[:, :f].set(x)


# --------------------------------------------------------------------------- #
# Wrapper
# --------------------------------------------------------------------------- #
def _vmem_budget_bytes():
    """Per-generation scoped-VMEM budget with headroom for compiler scratch."""
    try:
        cap = pltpu.get_tpu_info().vmem_capacity_bytes
    except Exception:
        cap = 128 << 20
    if cap <= (64 << 20):                       # v7x-class: 64 MiB per TensorCore
        return int(min(cap - (12 << 20), 52 << 20))
    return int(min(cap - (28 << 20), 100 << 20))  # v5e / v6e: 128 MiB per TC


def _resident_spec(block_shape, index_map):
    """Grid-invariant operand (constant index_map): single-buffer it so the
    resident copy costs 1x instead of 2x VMEM (matters most on v7x)."""
    buffered = getattr(pl, "Buffered", None)
    if buffered is not None:
        try:
            return pl.BlockSpec(block_shape, index_map, pipeline_mode=buffered(1))
        except TypeError:
            pass
    return pl.BlockSpec(block_shape, index_map)


def attention_layer(x_pad, wt_pad, b_pad, lane_mask, *, tb_max=1024,
                    use_bf16_mxu=False):
    """x_pad: (B, Fp) lane-padded input; wt_pad/b_pad/lane_mask from
    prepare_attention_params.  Returns (B, Fp); padded lanes hold ~0."""
    B, Fp = x_pad.shape
    assert wt_pad.shape == (Fp, Fp) and Fp % 128 == 0

    itemsize = jnp.dtype(x_pad.dtype).itemsize
    budget = _vmem_budget_bytes()

    # Resident (single-buffered) params: W^T + bias + mask (sublane-padded to 8 rows).
    resident = Fp * Fp * jnp.dtype(wt_pad.dtype).itemsize + 2 * 8 * Fp * 4
    if resident + 4 * 8 * Fp * itemsize > budget:
        # TODO(synk): feature-tiled (K/N-blocked) fallback with a two-pass softmax
        # for Fp where the resident weight alone exceeds the per-core VMEM budget.
        raise NotImplementedError("weight does not fit VMEM-resident; "
                                  "feature-tiled path not implemented")

    # Batch tile: largest sublane multiple keeping x/out double-buffered within
    # budget, capped at tb_max (and at the batch itself for tiny inputs).
    rows_fit = (budget - resident) // (2 * 2 * Fp * itemsize)
    TB = max(8, min(min(tb_max, _round_up(B, 8)), (rows_fit // 8) * 8))

    grid = (pl.cdiv(B, TB),)  # ragged last batch tile: Pallas masks OOB stores

    vmem_limit = int(min(budget,
                         max(16 << 20,
                             resident + 2 * 2 * TB * Fp * itemsize + (2 << 20))))

    mxu_dtype = (jnp.bfloat16
                 if (use_bf16_mxu and x_pad.dtype == jnp.float32) else None)
    kernel = functools.partial(_attention_layer_kernel, mxu_dtype=mxu_dtype)

    return pl.pallas_call(
        kernel,
        out_shape=jax.ShapeDtypeStruct((B, Fp), x_pad.dtype),
        grid_spec=pltpu.PrefetchScalarGridSpec(
            num_scalar_prefetch=0,
            grid=grid,
            in_specs=[
                pl.BlockSpec((TB, Fp), lambda i: (i, 0)),    # x: streamed per tile
                _resident_spec((Fp, Fp), lambda i: (0, 0)),  # W^T: resident, 1-buffered
                _resident_spec((1, Fp), lambda i: (0, 0)),   # bias: resident
                _resident_spec((1, Fp), lambda i: (0, 0)),   # additive lane mask
            ],
            out_specs=pl.BlockSpec((TB, Fp), lambda i: (i, 0)),
        ),
        compiler_params=pltpu.CompilerParams(
            dimension_semantics=("parallel",),  # shard batch tiles across TCs (v7x)
            vmem_limit_bytes=vmem_limit,
        ),
    )(x_pad, wt_pad, b_pad, lane_mask)


# --------------------------------------------------------------------------- #
# Demo / correctness check
# --------------------------------------------------------------------------- #
if __name__ == "__main__":
    key = jax.random.PRNGKey(0)
    batch, n_feats = 8, 32

    kx, kw, kb = jax.random.split(key, 3)
    x = jax.random.normal(kx, (batch, n_feats), dtype=jnp.float32)

    # Deterministic nn.Linear-style init: U(-1/sqrt(in), 1/sqrt(in))
    bound = 1.0 / jnp.sqrt(jnp.float32(n_feats))
    weight = jax.random.uniform(kw, (n_feats, n_feats), jnp.float32,
                                minval=-bound, maxval=bound)
    bias = jax.random.uniform(kb, (n_feats,), jnp.float32,
                              minval=-bound, maxval=bound)

    # One-time, off-hot-path layout prep: lane-padded W^T / bias / mask / input.
    wt_pad, b_pad, lane_mask = prepare_attention_params(weight, bias)
    f_pad = wt_pad.shape[0]
    x_pad = prepare_attention_input(x, f_pad)

    out_pad = attention_layer(x_pad, wt_pad, b_pad, lane_mask)
    out_pad = jax.block_until_ready(out_pad)
    out = out_pad[:, :n_feats]  # check-only slice (F < 128 in this tiny demo)

    # Plain-JAX reference of the forward semantics.
    lin_ref = x @ weight.T + bias
    ref = jax.nn.softmax(x * lin_ref, axis=1)
    assert out.shape == (batch, n_feats)
    # Tolerance accounts for the approx EUP reciprocal in the softmax normalize.
    assert jnp.allclose(out, ref, atol=1e-3, rtol=1e-3)

    print("KERNEL_OK")
</pallas_src>

<mosaic_0001>
module attributes {stable_mosaic.version = 11 : i64} {
  func.func @_attention_layer_kernel(%arg0: i32, %arg1: memref<8x128xf32, #tpu.memory_space<vmem>>, %arg2: memref<128x128xf32, #tpu.memory_space<vmem>>, %arg3: memref<1x128xf32, #tpu.memory_space<vmem>>, %arg4: memref<1x128xf32, #tpu.memory_space<vmem>>, %arg5: memref<8x128xf32, #tpu.memory_space<vmem>>) attributes {dimension_semantics = [#tpu.dimension_semantics<parallel>], iteration_bounds = array<i64: 1>, scalar_prefetch = 0 : i64, scratch_operands = 0 : i64, tpu.core_type = #tpu.core_type<tc>, window_params = [{transform_indices = @transform_0, window_bounds = array<i64: 8, 128>}, {pipeline_mode = #tpu.pipeline_mode<synchronous>, transform_indices = @transform_1, window_bounds = array<i64: 128, 128>}, {pipeline_mode = #tpu.pipeline_mode<synchronous>, transform_indices = @transform_2, window_bounds = array<i64: 1, 128>}, {pipeline_mode = #tpu.pipeline_mode<synchronous>, transform_indices = @transform_3, window_bounds = array<i64: 1, 128>}, {transform_indices = @transform_4, window_bounds = array<i64: 8, 128>}]} {
    %c0 = arith.constant 0 : index
    %c0_0 = arith.constant 0 : index
    %0 = vector.load %arg1[%c0, %c0_0] : memref<8x128xf32, #tpu.memory_space<vmem>>, vector<8x128xf32>
    %c0_1 = arith.constant 0 : index
    %c0_2 = arith.constant 0 : index
    %1 = vector.load %arg2[%c0_1, %c0_2] : memref<128x128xf32, #tpu.memory_space<vmem>>, vector<128x128xf32>
    %cst = arith.constant dense<0.000000e+00> : vector<8x128xf32>
    %2 = tpu.matmul %0, %1, %cst {dimension_numbers = #tpu.dot_dimension_numbers<[1], [0], [0], [1], [0, 0, 1, 1], [], []>} : vector<8x128xf32>, vector<128x128xf32>, vector<8x128xf32> -> vector<8x128xf32>
    %c0_3 = arith.constant 0 : index
    %c0_4 = arith.constant 0 : index
    %3 = vector.load %arg3[%c0_3, %c0_4] : memref<1x128xf32, #tpu.memory_space<vmem>>, vector<1x128xf32>
    %4 = vector.broadcast %3 : vector<1x128xf32> to vector<8x128xf32>
    %5 = arith.addf %2, %4 : vector<8x128xf32>
    %6 = arith.mulf %0, %5 : vector<8x128xf32>
    %c0_5 = arith.constant 0 : index
    %c0_6 = arith.constant 0 : index
    %7 = vector.load %arg4[%c0_5, %c0_6] : memref<1x128xf32, #tpu.memory_space<vmem>>, vector<1x128xf32>
    %8 = vector.broadcast %7 : vector<1x128xf32> to vector<8x128xf32>
    %9 = arith.addf %6, %8 : vector<8x128xf32>
    %cst_7 = arith.constant dense<0xFF800000> : vector<8xf32>
    %10 = vector.multi_reduction <maximumf>, %9, %cst_7 [1] : vector<8x128xf32> to vector<8xf32>
    %11 = vector.shape_cast %10 : vector<8xf32> to vector<8x1xf32>
    %12 = vector.broadcast %11 : vector<8x1xf32> to vector<8x128xf32>
    %13 = arith.subf %9, %12 : vector<8x128xf32>
    %14 = math.exp %13 : vector<8x128xf32>
    %cst_8 = arith.constant dense<0.000000e+00> : vector<8xf32>
    %15 = vector.multi_reduction <add>, %14, %cst_8 [1] : vector<8x128xf32> to vector<8xf32>
    %16 = vector.shape_cast %15 : vector<8xf32> to vector<8x1xf32>
    %17 = tpu.reciprocal %16 {approx = true} : vector<8x1xf32> -> vector<8x1xf32>
    %18 = vector.broadcast %17 : vector<8x1xf32> to vector<8x128xf32>
    %19 = arith.mulf %14, %18 : vector<8x128xf32>
    %c0_9 = arith.constant 0 : index
    %c0_10 = arith.constant 0 : index
    %20 = vector.load %arg5[%c0_9, %c0_10] : memref<8x128xf32, #tpu.memory_space<vmem>>, vector<8x128xf32>
    tpu.vector_store %arg5[%c0_9, %c0_10], %19 {strides = array<i32>} : memref<8x128xf32, #tpu.memory_space<vmem>>, vector<8x128xf32>,
    return
  }
  func.func @transform_0(%arg0: i32) -> (i32, i32) {
    %c0_i32 = arith.constant 0 : i32
    %c0_i32_0 = arith.constant 0 : i32
    return %arg0, %c0_i32 : i32, i32
  }
  func.func @transform_1(%arg0: i32) -> (i32, i32) {
    %c0_i32 = arith.constant 0 : i32
    %c0_i32_0 = arith.constant 0 : i32
    %c0_i32_1 = arith.constant 0 : i32
    return %c0_i32, %c0_i32_0 : i32, i32
  }
  func.func @transform_2(%arg0: i32) -> (i32, i32) {
    %c0_i32 = arith.constant 0 : i32
    %c0_i32_0 = arith.constant 0 : i32
    %c0_i32_1 = arith.constant 0 : i32
    return %c0_i32, %c0_i32_0 : i32, i32
  }
  func.func @transform_3(%arg0: i32) -> (i32, i32) {
    %c0_i32 = arith.constant 0 : i32
    %c0_i32_0 = arith.constant 0 : i32
    %c0_i32_1 = arith.constant 0 : i32
    return %c0_i32, %c0_i32_0 : i32, i32
  }
  func.func @transform_4(%arg0: i32) -> (i32, i32) {
    %c0_i32 = arith.constant 0 : i32
    %c0_i32_0 = arith.constant 0 : i32
    return %arg0, %c0_i32 : i32, i32
  }
}

</mosaic_0001>

<bundles_post_ra>
// kernel: tpu_custom_call.1
= control target key start
LH: loop header
LB: loop body
LE: loop exit
PB: predicated region body
PF: predicated region fallthrough
CT: control target
= control target key end

     0   :  { %9 = vsyncpa [#allocation3], 0  ;;  %s351_s0 = inlined_call_operand.hbm [shape: f32[8,128], index: 0, kind: input, shape index: {}]   ;;  %s352_s1 = inlined_call_operand.hbm [shape: f32[128,128], index: 1, kind: input, shape index: {}]   ;;  %s353_s2 = inlined_call_operand.vmem [shape: f32[1,128], index: 2, kind: input, shape index: {}]   ;;  %s354_s3 = inlined_call_operand.vmem [shape: f32[1,128], index: 3, kind: input, shape index: {}]   ;;  %s355_s4 = inlined_call_operand.hbm [shape: f32[8,128], index: 4, kind: output, shape index: {}]  }
   0x1   :  { %10 = vsyncpa [#allocation6], 0 }
   0x2   :  { %11 = vsyncpa [#allocation4], 0  ;;  %s304_s15 = smov [#allocation2]   ;;  %s305_s17 = smov [#allocation5]  }
   0x3   :  { %s18_s16 = sshll.u32 %s304_s15, 4  ;;  %s27_s18 = sshll.u32 %s305_s17, 4  ;;  %s19_s16 = int_to_ptr.vmem [resolvable:$true] %s18_s16  ;;  %s28_s18 = int_to_ptr.vmem [resolvable:$true] %s27_s18 }
   0x4   :  { %s246_s19 = scalar_lea.vmem %s19_s16, 128  ;;  %p251_p1 = scmp.lt.s32.totalorder %s19_s16, %s19_s16 }
   0x5   :  { %p247_p0 = scmp.ne.s32.totalorder %s19_s16, %s246_s19  ;;  %p252_p2 = scmp.lt.s32.totalorder %s246_s19, %s246_s19 }
   0x7   :  { %p253_p3 = por %p252_p2, %p251_p1 }
   0x9   :  { %p254_p4 = pnand %p253_p3, %p247_p0 }
   0xb   :  { %257 = shalt.err (!%p254_p4)
}
   0xc   :  { %21 = dma.hbm_to_vmem [thread:$0]  %s351_s0, 128, %s19_s16, [#allocation3]  }
   0xd   :  { %s266_s22 = scalar_lea.vmem %s28_s18, 2048  ;;  %p271_p6 = scmp.lt.s32.totalorder %s28_s18, %s28_s18 }
   0xe   :  { %p267_p5 = scmp.ne.s32.totalorder %s28_s18, %s266_s22  ;;  %p272_p7 = scmp.lt.s32.totalorder %s266_s22, %s266_s22 }
  0x10   :  { %p273_p8 = por %p272_p7, %p271_p6 }
  0x12   :  { %p274_p9 = pnand %p273_p8, %p267_p5 }
  0x14   :  { %277 = shalt.err (!%p274_p9)
}
  0x15   :  { %s306_s23 = smov 128   ;;  %s307_s24 = smov 8  }
  0x16   :  { %33 = dma.hbm_to_vmem [thread:$0]  %s352_s1, 2048, %s28_s18, [#allocation6], %s306_s23, %s306_s23, %s307_s24  }
  0x17   :  { %298 = dma.done.wait [#allocation3], 128  }
  0x18   :  { %299 = vsyncadd [#allocation3], 4294967168 }
  0x19   :  { %300 = dma.done.wait [#allocation6], 2048  }
  0x1a   :  { %301 = vsyncadd [#allocation6], 4294965248  ;;  %v308_v0 = vmov 0.0   ;;  %vm309_vm0 = vmmov 0   ;;  %v60_v1 = vld [vmem:[#allocation5 + $0x78] sm:$0xff]  ;;  %v59_v2 = vld [vmem:[#allocation5 + $0x70] sm:$0xff] }
  0x1b   :  { %192 = vmatprep.subr.mxu0 %v308_v0  ;;  %224 = vmatprep.mubr.msk.f32.mxu0 %vm309_vm0, %v308_v0  ;;  %v58_v3 = vld [vmem:[#allocation5 + $0x68] sm:$0xff]  ;;  %v57_v4 = vld [vmem:[#allocation5 + $0x60] sm:$0xff]  ;;  %v56_v5 = vld [vmem:[#allocation5 + $0x58] sm:$0xff]  ;;  %s310_s29 = smov [#allocation7]  }
  0x1c   :  { %193 = vmatpush3.msra.mxu0 %v60_v1  ;;  %v55_v6 = vld [vmem:[#allocation5 + $0x50] sm:$0xff]  ;;  %v54_v7 = vld [vmem:[#allocation5 + $0x48] sm:$0xff]  ;;  %v53_v8 = vld [vmem:[#allocation5 + $0x40] sm:$0xff] }
  0x1d   :  { %194 = vmatprep.subr.mxu0 %v308_v0  ;;  %v52_v9 = vld [vmem:[#allocation5 + $0x38] sm:$0xff]  ;;  %v51_v10 = vld [vmem:[#allocation5 + $0x30] sm:$0xff]  ;;  %v50_v11 = vld [vmem:[#allocation5 + $0x28] sm:$0xff] }
  0x1e   :  { %195 = vmatpush3.msra.mxu0 %v59_v2  ;;  %v49_v12 = vld [vmem:[#allocation5 + $0x20] sm:$0xff]  ;;  %v48_v13 = vld [vmem:[#allocation5 + $0x18] sm:$0xff]  ;;  %v47_v14 = vld [vmem:[#allocation5 + $0x10] sm:$0xff] }
  0x1f   :  { %196 = vmatprep.subr.mxu0 %v308_v0  ;;  %v46_v15 = vld [vmem:[#allocation5 + $0x8] sm:$0xff]  ;;  %v45_v16 = vld [vmem:[#allocation5] sm:$0xff]  ;;  %v44_v17 = vld [vmem:[#allocation2] sm:$0xff] }
  0x20   :  { %197 = vmatpush3.msra.mxu0 %v58_v3  ;;  %v173_v18 = vld [vmem:[%s353_s2] ss:$0 sm:$0xff]  ;;  %s163_s2 = sshll.u32 %s310_s29, 4  ;;  %s164_s2 = int_to_ptr.vmem [resolvable:$true] %s163_s2 }
  0x21   :  { %198 = vmatprep.subr.mxu0 %v308_v0  ;;  %v174_v22 = vld [vmem:[%s354_s3] ss:$0 sm:$0xff]  ;;  %s278_s30 = scalar_lea.vmem %s164_s2, 128  ;;  %p283_p11 = scmp.lt.s32.totalorder %s164_s2, %s164_s2 }
  0x22   :  { %199 = vmatpush3.msra.mxu0 %v57_v4  ;;  %p279_p10 = scmp.ne.s32.totalorder %s164_s2, %s278_s30  ;;  %p284_p12 = scmp.lt.s32.totalorder %s278_s30, %s278_s30 }
  0x23   :  { %200 = vmatprep.subr.mxu0 %v308_v0 }
  0x24   :  { %201 = vmatpush3.msra.mxu0 %v56_v5  ;;  %p285_p13 = por %p284_p12, %p283_p11 }
  0x25   :  { %202 = vmatprep.subr.mxu0 %v308_v0 }
  0x26   :  { %203 = vmatpush3.msra.mxu0 %v55_v6  ;;  %p286_p0 = pnand %p285_p13, %p279_p10 }
  0x27   :  { %204 = vmatprep.subr.mxu0 %v308_v0 }
  0x28   :  { %205 = vmatpush3.msra.mxu0 %v54_v7 }
  0x29   :  { %206 = vmatprep.subr.mxu0 %v308_v0 }
  0x2a   :  { %207 = vmatpush3.msra.mxu0 %v53_v8 }
  0x2b   :  { %208 = vmatprep.subr.mxu0 %v308_v0 }
  0x2c   :  { %209 = vmatpush3.msra.mxu0 %v52_v9 }
  0x2d   :  { %210 = vmatprep.subr.mxu0 %v308_v0 }
  0x2e   :  { %211 = vmatpush3.msra.mxu0 %v51_v10 }
  0x2f   :  { %212 = vmatprep.subr.mxu0 %v308_v0 }
  0x30   :  { %213 = vmatpush3.msra.mxu0 %v50_v11 }
  0x31   :  { %214 = vmatprep.subr.mxu0 %v308_v0 }
  0x32   :  { %215 = vmatpush3.msra.mxu0 %v49_v12 }
  0x33   :  { %216 = vmatprep.subr.mxu0 %v308_v0 }
  0x34   :  { %217 = vmatpush3.msra.mxu0 %v48_v13 }
  0x35   :  { %218 = vmatprep.subr.mxu0 %v308_v0 }
  0x36   :  { %219 = vmatpush3.msra.mxu0 %v47_v14 }
  0x37   :  { %220 = vmatprep.subr.mxu0 %v308_v0 }
  0x38   :  { %221 = vmatpush3.msra.mxu0 %v46_v15 }
  0x39   :  { %222 = vmatprep.subr.mxu0 %v308_v0 }
  0x3a   :  { %223 = vmatpush3.msra.mxu0 %v45_v16 }
  0x3b   :  { %225 = vmatmul.mubr.f32.vlgmr.msra.gmra.mxu0 %v44_v17 }
  0xfb   :  { %v134_v19 = vpop.f32.mrf.mxu0 }
  0xfc   :  { %v135_v20 = vadd.f32 %v173_v18, %v134_v19 }
  0xfd   :  { %v226_v21 = vpop.f32.mrf.mxu0 }
  0xfe   :  { %v138_v23 = vmul.f32 %v135_v20, %v44_v17 }
 0x100   :  { %v146_v24 = vadd.f32 %v174_v22, %v138_v23 }
 0x102   :  { %147 = vmax.xlane.f32.xlu0 %v146_v24 }
 0x18b   :  { %v148_v25 = vpop.xlane.xlu0 %147 }
 0x18c   :  { %v149_v26 = vsub.f32 %v146_v24, %v148_v25 }
 0x18e   :  { %v150_v27 = vmul.f32 1.442695, %v149_v26 }
 0x190   :  { %234 = vpow2.f32 %v150_v27 }
 0x19d   :  { %v235_v28 = vpop.eup %234 }
 0x19e   :  { %152 = vadd.xlane.f32.xlu0 %v235_v28 }
 0x227   :  { %v153_v29 = vpop.xlane.xlu0 %152 }
 0x228   :  { %236 = vrcp.f32 %v153_v29 }
 0x235   :  { %v237_v30 = vpop.eup %236 }
 0x236   :  { %v155_v31 = vmul.f32 %v237_v30, %v235_v28 }
 0x238   :  { %156 = vst [vmem:[#allocation7] sm:$0xff] %v155_v31 }
 0x239   :  { %289 = shalt.err (!%p286_p0)
}
 0x23a   :  { %166 = dma.vmem_to_hbm [thread:$0]  %s164_s2, 128, %s355_s4, [#allocation4]  }
 0x23b   :  { %302 = dma.done.wait [#allocation4], 128  }
 0x23c   :  { %303 = vsyncadd [#allocation4], 4294967168 }
 0x23d   :  { %170 = vsyncpa [#allocation3], 1 }
 0x23e   :  { %171 = vsyncpa [#allocation6], 1 }
 0x23f   :  { %172 = vsyncpa [#allocation4], 1 }

</bundles_post_ra>
